<compile_context>
chip_gen: v7x
topology: tpu7x:2x2x1
jax: 0.10.0
libtpu: 0.0.40
codegen_flags: <defaults>
</compile_context>

<pallas_src>
import jax
import jax.numpy as jnp
import numpy as np
from jax import lax
from jax.experimental import pallas as pl
from jax.experimental.pallas import tpu as pltpu

# ----------------------------- model sizes ---------------------------------
VOCAB = 50
EMBED_DIM = 16
HIDDEN_DIM = 32
NUM_CLASSES = 6
SEQ_LEN = 8
BATCH = 2
DROPOUT_RATE = 0.5  # identity in eval mode
B_TILE = 8          # f32 sublane tile: pad batch to a multiple of 8 rows


# ------------------------------ Pallas kernel -------------------------------
def _bilstm_kernel(ids_ref,      # (T*Bt, 1) int32  token ids for this batch tile, t-major b-minor
                   emb_ref,      # (V, E)    f32    embedding table
                   w_in_f_ref,   # (E, 4H)   f32    W_ih_l0.T (forward)
                   b_in_f_ref,   # (1, 4H)   f32    b_ih_f + b_hh_f
                   w_in_b_ref,   # (E, 4H)   f32    W_ih_l0_reverse.T (backward)
                   b_in_b_ref,   # (1, 4H)   f32    b_ih_b + b_hh_b
                   whh_f_ref,    # (H, 4H)   f32    W_hh_l0.T (forward only)
                   wlin_f_ref,   # (H, C)    f32    W_lin[:, :H].T
                   wlin_b_ref,   # (H, C)    f32    W_lin[:, H:].T
                   blin_ref,     # (1, C)    f32
                   out_ref):     # (Bt, C)   f32
    TB = ids_ref.shape[0]
    Bt = out_ref.shape[0]
    T = TB // Bt
    V = emb_ref.shape[0]
    H = whh_f_ref.shape[0]

    # --- Embedding lookup fused in-kernel as a one-hot MXU matmul (no gather).
    #     Fine at V=50; switch to a scalar-prefetch gather for realistic vocab.
    ids = ids_ref[...]                                              # (TB, 1)
    iota = lax.broadcasted_iota(jnp.int32, (TB, V), 1)
    onehot = (iota == ids).astype(jnp.float32)                      # (TB, V)
    x = jnp.dot(onehot, emb_ref[...],
                preferred_element_type=jnp.float32)                 # (TB, E)

    # --- Forward-direction input projections for ALL timesteps in one matmul,
    #     biases folded in.  Backward projections are no longer computed for
    #     every t (only x[T-1] is needed below).
    proj_f = (jnp.dot(x, w_in_f_ref[...], preferred_element_type=jnp.float32)
              + b_in_f_ref[...])                                    # (TB, 4H)

    whh = whh_f_ref[...]   # hoisted: loaded once, not per unrolled iteration
    # NOTE: explicit MXU weight-staging (pltpu.matmul_push_rhs / matmul_acc_lhs /
    # matmul_pop) would keep W_hh resident across the 8 dependent steps; kept as
    # jnp.dot here for portability/robustness across chip generations.

    # --- Forward recurrence: only h @ W_hh remains on the serial chain.
    #     Gate layout (PyTorch): [i | f | g | o], each of width H; 4H = 128 lanes.
    #     Bt = 8 -> every proj_f slab is a sublane-aligned (8, 128) read.
    h_f = jnp.zeros((Bt, H), jnp.float32)
    c_f = jnp.zeros((Bt, H), jnp.float32)
    for t in range(T):
        gates = (proj_f[t * Bt:(t + 1) * Bt, :]
                 + jnp.dot(h_f, whh, preferred_element_type=jnp.float32))
        sg = jax.nn.sigmoid(gates)        # one full-128-lane sigmoid pass
        tg = jnp.tanh(gates)              # one full-128-lane tanh pass
        i_g = sg[:, 0 * H:1 * H]
        f_g = sg[:, 1 * H:2 * H]
        g_g = tg[:, 2 * H:3 * H]
        o_g = sg[:, 3 * H:4 * H]
        c_f = f_g * c_f + i_g * g_g
        h_f = o_g * jnp.tanh(c_f)

    # --- Reverse-direction half of output[-1]: one cell step on x[T-1] from
    #     zero state.  h = c = 0  =>  no h @ W_hh_b term and the forget gate is
    #     irrelevant (f * 0 == 0).  Single small (Bt, E) @ (E, 4H) projection.
    x_last = x[(T - 1) * Bt:TB, :]                                  # (Bt, E)
    gb = (jnp.dot(x_last, w_in_b_ref[...], preferred_element_type=jnp.float32)
          + b_in_b_ref[...])                                        # (Bt, 4H)
    sgb = jax.nn.sigmoid(gb)
    tgb = jnp.tanh(gb)
    i_b = sgb[:, 0 * H:1 * H]
    g_b = tgb[:, 2 * H:3 * H]
    o_b = sgb[:, 3 * H:4 * H]
    h_b = o_b * jnp.tanh(i_b * g_b)

    # --- Classifier without the lane-axis concat: two small dots, one sum.
    out_ref[...] = (jnp.dot(h_f, wlin_f_ref[...], preferred_element_type=jnp.float32)
                    + jnp.dot(h_b, wlin_b_ref[...], preferred_element_type=jnp.float32)
                    + blin_ref[...])


# --------------------- one-time parameter re-packing -------------------------
def prepare_params(params):
    """Fold transposes / bias sums into the stored params once, outside the
    per-call jit (no per-call prep ops)."""
    H = HIDDEN_DIM
    return {
        "embedding": params["embedding"].astype(jnp.float32),                        # (V, E)
        "w_in_f": params["w_ih_f"].T.astype(jnp.float32),                            # (E, 4H)
        "b_in_f": (params["b_ih_f"] + params["b_hh_f"]).reshape(1, 4 * H).astype(jnp.float32),
        "w_in_b": params["w_ih_b"].T.astype(jnp.float32),                            # (E, 4H)
        "b_in_b": (params["b_ih_b"] + params["b_hh_b"]).reshape(1, 4 * H).astype(jnp.float32),
        "w_hh_f": params["w_hh_f"].T.astype(jnp.float32),                            # (H, 4H)
        "w_lin_f": params["w_lin"][:, :H].T.astype(jnp.float32),                     # (H, C)
        "w_lin_b": params["w_lin"][:, H:].T.astype(jnp.float32),                     # (H, C)
        "b_lin": params["b_lin"].reshape(1, NUM_CLASSES).astype(jnp.float32),        # (1, C)
    }


# ------------------------------ JAX wrapper ---------------------------------
@jax.jit
def bilstm_classifier_forward(seq_x, prep):
    T, B = seq_x.shape
    nb = pl.cdiv(B, B_TILE)
    B_pad = nb * B_TILE

    ids = seq_x.astype(jnp.int32)
    if B_pad != B:
        ids = jnp.pad(ids, ((0, 0), (0, B_pad - B)))   # pad rows: token id 0
    # (T, B_pad) -> (nb, T*B_TILE, 1): one t-major b-minor id column per batch tile.
    ids = ids.reshape(T, nb, B_TILE).transpose(1, 0, 2).reshape(nb, T * B_TILE, 1)

    full2d = lambda arr: pl.BlockSpec(arr.shape, lambda i: (0, 0))   # resident weights

    out = pl.pallas_call(
        _bilstm_kernel,
        out_shape=jax.ShapeDtypeStruct((B_pad, NUM_CLASSES), jnp.float32),
        grid=(nb,),
        in_specs=[
            pl.BlockSpec((None, T * B_TILE, 1), lambda i: (i, 0, 0)),   # ids, tiled over batch
            full2d(prep["embedding"]),
            full2d(prep["w_in_f"]),
            full2d(prep["b_in_f"]),
            full2d(prep["w_in_b"]),
            full2d(prep["b_in_b"]),
            full2d(prep["w_hh_f"]),
            full2d(prep["w_lin_f"]),
            full2d(prep["w_lin_b"]),
            full2d(prep["b_lin"]),
        ],
        out_specs=pl.BlockSpec((B_TILE, NUM_CLASSES), lambda i: (i, 0)),
        compiler_params=pltpu.CompilerParams(
            dimension_semantics=("parallel",)),   # batch tiles shard across v7x cores
    )(ids, prep["embedding"], prep["w_in_f"], prep["b_in_f"],
      prep["w_in_b"], prep["b_in_b"], prep["w_hh_f"],
      prep["w_lin_f"], prep["w_lin_b"], prep["b_lin"])

    return out[:B]   # drop padded batch rows


# ------------------- pure-JAX reference (faithful PyTorch) -------------------
def bilstm_reference(seq_x, params):
    """Full bidirectional LSTM; takes output[-1] exactly as the module does."""
    embed_x = params["embedding"][seq_x]          # (T, B, E)
    T, B, _ = embed_x.shape
    H = HIDDEN_DIM

    def cell(x_t, h, c, w_ih, w_hh, b_ih, b_hh):
        gates = x_t @ w_ih.T + b_ih + h @ w_hh.T + b_hh
        i = jax.nn.sigmoid(gates[:, 0 * H:1 * H])
        f = jax.nn.sigmoid(gates[:, 1 * H:2 * H])
        g = jnp.tanh(gates[:, 2 * H:3 * H])
        o = jax.nn.sigmoid(gates[:, 3 * H:4 * H])
        c_new = f * c + i * g
        return o * jnp.tanh(c_new), c_new

    h = jnp.zeros((B, H), jnp.float32)
    c = jnp.zeros((B, H), jnp.float32)
    fwd_out = []
    for t in range(T):
        h, c = cell(embed_x[t], h, c, params["w_ih_f"], params["w_hh_f"],
                    params["b_ih_f"], params["b_hh_f"])
        fwd_out.append(h)

    h = jnp.zeros((B, H), jnp.float32)
    c = jnp.zeros((B, H), jnp.float32)
    bwd_out = [None] * T
    for t in range(T - 1, -1, -1):
        h, c = cell(embed_x[t], h, c, params["w_ih_b"], params["w_hh_b"],
                    params["b_ih_b"], params["b_hh_b"])
        bwd_out[t] = h

    feature = jnp.concatenate([fwd_out[T - 1], bwd_out[T - 1]], axis=-1)  # output[-1]
    return feature @ params["w_lin"].T + params["b_lin"]


# ------------------------------ parameter init -------------------------------
def init_params(key):
    ks = jax.random.split(key, 12)
    H, E = HIDDEN_DIM, EMBED_DIM
    scale = 1.0 / np.sqrt(H)
    u = lambda k, shape: jax.random.uniform(k, shape, jnp.float32, -scale, scale)
    return {
        "embedding": jax.random.normal(ks[0], (VOCAB, E), jnp.float32),
        "w_ih_f": u(ks[1], (4 * H, E)),
        "w_hh_f": u(ks[2], (4 * H, H)),
        "b_ih_f": u(ks[3], (4 * H,)),
        "b_hh_f": u(ks[4], (4 * H,)),
        "w_ih_b": u(ks[5], (4 * H, E)),
        "w_hh_b": u(ks[6], (4 * H, H)),
        "b_ih_b": u(ks[7], (4 * H,)),
        "b_hh_b": u(ks[8], (4 * H,)),
        "w_lin": u(ks[9], (NUM_CLASSES, 2 * H)),
        "b_lin": u(ks[10], (NUM_CLASSES,)),
    }


if __name__ == "__main__":
    key = jax.random.PRNGKey(0)
    pkey, dkey = jax.random.split(key)
    params = init_params(pkey)
    prep = prepare_params(params)   # one-time weight re-packing (outside jit)

    # seq_x: (T, B) token ids — sequence-first, as nn.LSTM default expects.
    seq_x = jax.random.randint(dkey, (SEQ_LEN, BATCH), 0, VOCAB, jnp.int32)

    logits = bilstm_classifier_forward(seq_x, prep)
    logits = jax.block_until_ready(logits)

    ref = bilstm_reference(seq_x, params)
    np.testing.assert_allclose(np.asarray(logits), np.asarray(ref),
                               rtol=1e-5, atol=1e-5)
    assert logits.shape == (BATCH, NUM_CLASSES)
    print("KERNEL_OK")
</pallas_src>

<mosaic_0001>
module attributes {stable_mosaic.version = 11 : i64} {
  func.func @_bilstm_kernel(%arg0: i32, %arg1: memref<1x64x1xi32, #tpu.memory_space<vmem>>, %arg2: memref<50x16xf32, #tpu.memory_space<vmem>>, %arg3: memref<16x128xf32, #tpu.memory_space<vmem>>, %arg4: memref<1x128xf32, #tpu.memory_space<vmem>>, %arg5: memref<16x128xf32, #tpu.memory_space<vmem>>, %arg6: memref<1x128xf32, #tpu.memory_space<vmem>>, %arg7: memref<32x128xf32, #tpu.memory_space<vmem>>, %arg8: memref<32x6xf32, #tpu.memory_space<vmem>>, %arg9: memref<32x6xf32, #tpu.memory_space<vmem>>, %arg10: memref<1x6xf32, #tpu.memory_space<vmem>>, %arg11: memref<8x6xf32, #tpu.memory_space<vmem>>) attributes {dimension_semantics = [#tpu.dimension_semantics<parallel>], iteration_bounds = array<i64: 1>, scalar_prefetch = 0 : i64, scratch_operands = 0 : i64, tpu.core_type = #tpu.core_type<tc>, window_params = [{transform_indices = @transform_0, window_bounds = array<i64: 1, 64, 1>}, {pipeline_mode = #tpu.pipeline_mode<synchronous>, transform_indices = @transform_1, window_bounds = array<i64: 50, 16>}, {pipeline_mode = #tpu.pipeline_mode<synchronous>, transform_indices = @transform_2, window_bounds = array<i64: 16, 128>}, {pipeline_mode = #tpu.pipeline_mode<synchronous>, transform_indices = @transform_3, window_bounds = array<i64: 1, 128>}, {pipeline_mode = #tpu.pipeline_mode<synchronous>, transform_indices = @transform_4, window_bounds = array<i64: 16, 128>}, {pipeline_mode = #tpu.pipeline_mode<synchronous>, transform_indices = @transform_5, window_bounds = array<i64: 1, 128>}, {pipeline_mode = #tpu.pipeline_mode<synchronous>, transform_indices = @transform_6, window_bounds = array<i64: 32, 128>}, {pipeline_mode = #tpu.pipeline_mode<synchronous>, transform_indices = @transform_7, window_bounds = array<i64: 32, 6>}, {pipeline_mode = #tpu.pipeline_mode<synchronous>, transform_indices = @transform_8, window_bounds = array<i64: 32, 6>}, {pipeline_mode = #tpu.pipeline_mode<synchronous>, transform_indices = @transform_9, window_bounds = array<i64: 1, 6>}, {transform_indices = @transform_10, window_bounds = array<i64: 8, 6>}]} {
    %c0 = arith.constant 0 : index
    %c0_0 = arith.constant 0 : index
    %c0_1 = arith.constant 0 : index
    %0 = vector.load %arg1[%c0, %c0_0, %c0_1] : memref<1x64x1xi32, #tpu.memory_space<vmem>>, vector<1x64x1xi32>
    %1 = vector.shape_cast %0 : vector<1x64x1xi32> to vector<64x1xi32>
    %2 = tpu.iota {dimensions = array<i32: 1>} : vector<64x50xi32>
    %3 = vector.broadcast %1 : vector<64x1xi32> to vector<64x50xi32>
    %4 = arith.cmpi eq, %2, %3 : vector<64x50xi32>
    %5 = arith.extui %4 : vector<64x50xi1> to vector<64x50xi32>
    %6 = arith.sitofp %5 : vector<64x50xi32> to vector<64x50xf32>
    %c0_2 = arith.constant 0 : index
    %c0_3 = arith.constant 0 : index
    %7 = vector.load %arg2[%c0_2, %c0_3] : memref<50x16xf32, #tpu.memory_space<vmem>>, vector<50x16xf32>
    %cst = arith.constant dense<0.000000e+00> : vector<64x16xf32>
    %8 = tpu.matmul %6, %7, %cst {dimension_numbers = #tpu.dot_dimension_numbers<[1], [0], [0], [1], [0, 0, 1, 1], [], []>} : vector<64x50xf32>, vector<50x16xf32>, vector<64x16xf32> -> vector<64x16xf32>
    %c0_4 = arith.constant 0 : index
    %c0_5 = arith.constant 0 : index
    %9 = vector.load %arg3[%c0_4, %c0_5] : memref<16x128xf32, #tpu.memory_space<vmem>>, vector<16x128xf32>
    %cst_6 = arith.constant dense<0.000000e+00> : vector<64x128xf32>
    %10 = tpu.matmul %8, %9, %cst_6 {dimension_numbers = #tpu.dot_dimension_numbers<[1], [0], [0], [1], [0, 0, 1, 1], [], []>} : vector<64x16xf32>, vector<16x128xf32>, vector<64x128xf32> -> vector<64x128xf32>
    %c0_7 = arith.constant 0 : index
    %c0_8 = arith.constant 0 : index
    %11 = vector.load %arg4[%c0_7, %c0_8] : memref<1x128xf32, #tpu.memory_space<vmem>>, vector<1x128xf32>
    %12 = vector.broadcast %11 : vector<1x128xf32> to vector<64x128xf32>
    %13 = arith.addf %10, %12 : vector<64x128xf32>
    %c0_9 = arith.constant 0 : index
    %c0_10 = arith.constant 0 : index
    %14 = vector.load %arg7[%c0_9, %c0_10] : memref<32x128xf32, #tpu.memory_space<vmem>>, vector<32x128xf32>
    %cst_11 = arith.constant 0.000000e+00 : f32
    %15 = vector.broadcast %cst_11 : f32 to vector<8x32xf32>
    %cst_12 = arith.constant 0.000000e+00 : f32
    %16 = vector.broadcast %cst_12 : f32 to vector<8x32xf32>
    %17 = vector.extract_strided_slice %13 {offsets = [0, 0], sizes = [8, 128], strides = [1, 1]} : vector<64x128xf32> to vector<8x128xf32>
    %cst_13 = arith.constant dense<0.000000e+00> : vector<8x128xf32>
    %18 = tpu.matmul %15, %14, %cst_13 {dimension_numbers = #tpu.dot_dimension_numbers<[1], [0], [0], [1], [0, 0, 1, 1], [], []>} : vector<8x32xf32>, vector<32x128xf32>, vector<8x128xf32> -> vector<8x128xf32>
    %19 = arith.addf %17, %18 : vector<8x128xf32>
    %20 = arith.negf %19 : vector<8x128xf32>
    %21 = math.exp %20 : vector<8x128xf32>
    %cst_14 = arith.constant 1.000000e+00 : f32
    %22 = vector.broadcast %cst_14 : f32 to vector<8x128xf32>
    %23 = arith.addf %22, %21 : vector<8x128xf32>
    %24 = arith.divf %22, %23 : vector<8x128xf32>
    %25 = math.tanh %19 : vector<8x128xf32>
    %26 = vector.extract_strided_slice %24 {offsets = [0, 0], sizes = [8, 32], strides = [1, 1]} : vector<8x128xf32> to vector<8x32xf32>
    %27 = vector.extract_strided_slice %24 {offsets = [0, 32], sizes = [8, 32], strides = [1, 1]} : vector<8x128xf32> to vector<8x32xf32>
    %28 = vector.extract_strided_slice %25 {offsets = [0, 64], sizes = [8, 32], strides = [1, 1]} : vector<8x128xf32> to vector<8x32xf32>
    %29 = vector.extract_strided_slice %24 {offsets = [0, 96], sizes = [8, 32], strides = [1, 1]} : vector<8x128xf32> to vector<8x32xf32>
    %30 = arith.mulf %27, %16 : vector<8x32xf32>
    %31 = arith.mulf %26, %28 : vector<8x32xf32>
    %32 = arith.addf %30, %31 : vector<8x32xf32>
    %33 = math.tanh %32 : vector<8x32xf32>
    %34 = arith.mulf %29, %33 : vector<8x32xf32>
    %35 = vector.extract_strided_slice %13 {offsets = [8, 0], sizes = [8, 128], strides = [1, 1]} : vector<64x128xf32> to vector<8x128xf32>
    %cst_15 = arith.constant dense<0.000000e+00> : vector<8x128xf32>
    %36 = tpu.matmul %34, %14, %cst_15 {dimension_numbers = #tpu.dot_dimension_numbers<[1], [0], [0], [1], [0, 0, 1, 1], [], []>} : vector<8x32xf32>, vector<32x128xf32>, vector<8x128xf32> -> vector<8x128xf32>
    %37 = arith.addf %35, %36 : vector<8x128xf32>
    %38 = arith.negf %37 : vector<8x128xf32>
    %39 = math.exp %38 : vector<8x128xf32>
    %cst_16 = arith.constant 1.000000e+00 : f32
    %40 = vector.broadcast %cst_16 : f32 to vector<8x128xf32>
    %41 = arith.addf %40, %39 : vector<8x128xf32>
    %42 = arith.divf %40, %41 : vector<8x128xf32>
    %43 = math.tanh %37 : vector<8x128xf32>
    %44 = vector.extract_strided_slice %42 {offsets = [0, 0], sizes = [8, 32], strides = [1, 1]} : vector<8x128xf32> to vector<8x32xf32>
    %45 = vector.extract_strided_slice %42 {offsets = [0, 32], sizes = [8, 32], strides = [1, 1]} : vector<8x128xf32> to vector<8x32xf32>
    %46 = vector.extract_strided_slice %43 {offsets = [0, 64], sizes = [8, 32], strides = [1, 1]} : vector<8x128xf32> to vector<8x32xf32>
    %47 = vector.extract_strided_slice %42 {offsets = [0, 96], sizes = [8, 32], strides = [1, 1]} : vector<8x128xf32> to vector<8x32xf32>
    %48 = arith.mulf %45, %32 : vector<8x32xf32>
    %49 = arith.mulf %44, %46 : vector<8x32xf32>
    %50 = arith.addf %48, %49 : vector<8x32xf32>
    %51 = math.tanh %50 : vector<8x32xf32>
    %52 = arith.mulf %47, %51 : vector<8x32xf32>
    %53 = vector.extract_strided_slice %13 {offsets = [16, 0], sizes = [8, 128], strides = [1, 1]} : vector<64x128xf32> to vector<8x128xf32>
    %cst_17 = arith.constant dense<0.000000e+00> : vector<8x128xf32>
    %54 = tpu.matmul %52, %14, %cst_17 {dimension_numbers = #tpu.dot_dimension_numbers<[1], [0], [0], [1], [0, 0, 1, 1], [], []>} : vector<8x32xf32>, vector<32x128xf32>, vector<8x128xf32> -> vector<8x128xf32>
    %55 = arith.addf %53, %54 : vector<8x128xf32>
    %56 = arith.negf %55 : vector<8x128xf32>
    %57 = math.exp %56 : vector<8x128xf32>
    %cst_18 = arith.constant 1.000000e+00 : f32
    %58 = vector.broadcast %cst_18 : f32 to vector<8x128xf32>
    %59 = arith.addf %58, %57 : vector<8x128xf32>
    %60 = arith.divf %58, %59 : vector<8x128xf32>
    %61 = math.tanh %55 : vector<8x128xf32>
    %62 = vector.extract_strided_slice %60 {offsets = [0, 0], sizes = [8, 32], strides = [1, 1]} : vector<8x128xf32> to vector<8x32xf32>
    %63 = vector.extract_strided_slice %60 {offsets = [0, 32], sizes = [8, 32], strides = [1, 1]} : vector<8x128xf32> to vector<8x32xf32>
    %64 = vector.extract_strided_slice %61 {offsets = [0, 64], sizes = [8, 32], strides = [1, 1]} : vector<8x128xf32> to vector<8x32xf32>
    %65 = vector.extract_strided_slice %60 {offsets = [0, 96], sizes = [8, 32], strides = [1, 1]} : vector<8x128xf32> to vector<8x32xf32>
    %66 = arith.mulf %63, %50 : vector<8x32xf32>
    %67 = arith.mulf %62, %64 : vector<8x32xf32>
    %68 = arith.addf %66, %67 : vector<8x32xf32>
    %69 = math.tanh %68 : vector<8x32xf32>
    %70 = arith.mulf %65, %69 : vector<8x32xf32>
    %71 = vector.extract_strided_slice %13 {offsets = [24, 0], sizes = [8, 128], strides = [1, 1]} : vector<64x128xf32> to vector<8x128xf32>
    %cst_19 = arith.constant dense<0.000000e+00> : vector<8x128xf32>
    %72 = tpu.matmul %70, %14, %cst_19 {dimension_numbers = #tpu.dot_dimension_numbers<[1], [0], [0], [1], [0, 0, 1, 1], [], []>} : vector<8x32xf32>, vector<32x128xf32>, vector<8x128xf32> -> vector<8x128xf32>
    %73 = arith.addf %71, %72 : vector<8x128xf32>
    %74 = arith.negf %73 : vector<8x128xf32>
    %75 = math.exp %74 : vector<8x128xf32>
    %cst_20 = arith.constant 1.000000e+00 : f32
    %76 = vector.broadcast %cst_20 : f32 to vector<8x128xf32>
    %77 = arith.addf %76, %75 : vector<8x128xf32>
    %78 = arith.divf %76, %77 : vector<8x128xf32>
    %79 = math.tanh %73 : vector<8x128xf32>
    %80 = vector.extract_strided_slice %78 {offsets = [0, 0], sizes = [8, 32], strides = [1, 1]} : vector<8x128xf32> to vector<8x32xf32>
    %81 = vector.extract_strided_slice %78 {offsets = [0, 32], sizes = [8, 32], strides = [1, 1]} : vector<8x128xf32> to vector<8x32xf32>
    %82 = vector.extract_strided_slice %79 {offsets = [0, 64], sizes = [8, 32], strides = [1, 1]} : vector<8x128xf32> to vector<8x32xf32>
    %83 = vector.extract_strided_slice %78 {offsets = [0, 96], sizes = [8, 32], strides = [1, 1]} : vector<8x128xf32> to vector<8x32xf32>
    %84 = arith.mulf %81, %68 : vector<8x32xf32>
    %85 = arith.mulf %80, %82 : vector<8x32xf32>
    %86 = arith.addf %84, %85 : vector<8x32xf32>
    %87 = math.tanh %86 : vector<8x32xf32>
    %88 = arith.mulf %83, %87 : vector<8x32xf32>
    %89 = vector.extract_strided_slice %13 {offsets = [32, 0], sizes = [8, 128], strides = [1, 1]} : vector<64x128xf32> to vector<8x128xf32>
    %cst_21 = arith.constant dense<0.000000e+00> : vector<8x128xf32>
    %90 = tpu.matmul %88, %14, %cst_21 {dimension_numbers = #tpu.dot_dimension_numbers<[1], [0], [0], [1], [0, 0, 1, 1], [], []>} : vector<8x32xf32>, vector<32x128xf32>, vector<8x128xf32> -> vector<8x128xf32>
    %91 = arith.addf %89, %90 : vector<8x128xf32>
    %92 = arith.negf %91 : vector<8x128xf32>
    %93 = math.exp %92 : vector<8x128xf32>
    %cst_22 = arith.constant 1.000000e+00 : f32
    %94 = vector.broadcast %cst_22 : f32 to vector<8x128xf32>
    %95 = arith.addf %94, %93 : vector<8x128xf32>
    %96 = arith.divf %94, %95 : vector<8x128xf32>
    %97 = math.tanh %91 : vector<8x128xf32>
    %98 = vector.extract_strided_slice %96 {offsets = [0, 0], sizes = [8, 32], strides = [1, 1]} : vector<8x128xf32> to vector<8x32xf32>
    %99 = vector.extract_strided_slice %96 {offsets = [0, 32], sizes = [8, 32], strides = [1, 1]} : vector<8x128xf32> to vector<8x32xf32>
    %100 = vector.extract_strided_slice %97 {offsets = [0, 64], sizes = [8, 32], strides = [1, 1]} : vector<8x128xf32> to vector<8x32xf32>
    %101 = vector.extract_strided_slice %96 {offsets = [0, 96], sizes = [8, 32], strides = [1, 1]} : vector<8x128xf32> to vector<8x32xf32>
    %102 = arith.mulf %99, %86 : vector<8x32xf32>
    %103 = arith.mulf %98, %100 : vector<8x32xf32>
    %104 = arith.addf %102, %103 : vector<8x32xf32>
    %105 = math.tanh %104 : vector<8x32xf32>
    %106 = arith.mulf %101, %105 : vector<8x32xf32>
    %107 = vector.extract_strided_slice %13 {offsets = [40, 0], sizes = [8, 128], strides = [1, 1]} : vector<64x128xf32> to vector<8x128xf32>
    %cst_23 = arith.constant dense<0.000000e+00> : vector<8x128xf32>
    %108 = tpu.matmul %106, %14, %cst_23 {dimension_numbers = #tpu.dot_dimension_numbers<[1], [0], [0], [1], [0, 0, 1, 1], [], []>} : vector<8x32xf32>, vector<32x128xf32>, vector<8x128xf32> -> vector<8x128xf32>
    %109 = arith.addf %107, %108 : vector<8x128xf32>
    %110 = arith.negf %109 : vector<8x128xf32>
    %111 = math.exp %110 : vector<8x128xf32>
    %cst_24 = arith.constant 1.000000e+00 : f32
    %112 = vector.broadcast %cst_24 : f32 to vector<8x128xf32>
    %113 = arith.addf %112, %111 : vector<8x128xf32>
    %114 = arith.divf %112, %113 : vector<8x128xf32>
    %115 = math.tanh %109 : vector<8x128xf32>
    %116 = vector.extract_strided_slice %114 {offsets = [0, 0], sizes = [8, 32], strides = [1, 1]} : vector<8x128xf32> to vector<8x32xf32>
    %117 = vector.extract_strided_slice %114 {offsets = [0, 32], sizes = [8, 32], strides = [1, 1]} : vector<8x128xf32> to vector<8x32xf32>
    %118 = vector.extract_strided_slice %115 {offsets = [0, 64], sizes = [8, 32], strides = [1, 1]} : vector<8x128xf32> to vector<8x32xf32>
    %119 = vector.extract_strided_slice %114 {offsets = [0, 96], sizes = [8, 32], strides = [1, 1]} : vector<8x128xf32> to vector<8x32xf32>
    %120 = arith.mulf %117, %104 : vector<8x32xf32>
    %121 = arith.mulf %116, %118 : vector<8x32xf32>
    %122 = arith.addf %120, %121 : vector<8x32xf32>
    %123 = math.tanh %122 : vector<8x32xf32>
    %124 = arith.mulf %119, %123 : vector<8x32xf32>
    %125 = vector.extract_strided_slice %13 {offsets = [48, 0], sizes = [8, 128], strides = [1, 1]} : vector<64x128xf32> to vector<8x128xf32>
    %cst_25 = arith.constant dense<0.000000e+00> : vector<8x128xf32>
    %126 = tpu.matmul %124, %14, %cst_25 {dimension_numbers = #tpu.dot_dimension_numbers<[1], [0], [0], [1], [0, 0, 1, 1], [], []>} : vector<8x32xf32>, vector<32x128xf32>, vector<8x128xf32> -> vector<8x128xf32>
    %127 = arith.addf %125, %126 : vector<8x128xf32>
    %128 = arith.negf %127 : vector<8x128xf32>
    %129 = math.exp %128 : vector<8x128xf32>
    %cst_26 = arith.constant 1.000000e+00 : f32
    %130 = vector.broadcast %cst_26 : f32 to vector<8x128xf32>
    %131 = arith.addf %130, %129 : vector<8x128xf32>
    %132 = arith.divf %130, %131 : vector<8x128xf32>
    %133 = math.tanh %127 : vector<8x128xf32>
    %134 = vector.extract_strided_slice %132 {offsets = [0, 0], sizes = [8, 32], strides = [1, 1]} : vector<8x128xf32> to vector<8x32xf32>
    %135 = vector.extract_strided_slice %132 {offsets = [0, 32], sizes = [8, 32], strides = [1, 1]} : vector<8x128xf32> to vector<8x32xf32>
    %136 = vector.extract_strided_slice %133 {offsets = [0, 64], sizes = [8, 32], strides = [1, 1]} : vector<8x128xf32> to vector<8x32xf32>
    %137 = vector.extract_strided_slice %132 {offsets = [0, 96], sizes = [8, 32], strides = [1, 1]} : vector<8x128xf32> to vector<8x32xf32>
    %138 = arith.mulf %135, %122 : vector<8x32xf32>
    %139 = arith.mulf %134, %136 : vector<8x32xf32>
    %140 = arith.addf %138, %139 : vector<8x32xf32>
    %141 = math.tanh %140 : vector<8x32xf32>
    %142 = arith.mulf %137, %141 : vector<8x32xf32>
    %143 = vector.extract_strided_slice %13 {offsets = [56, 0], sizes = [8, 128], strides = [1, 1]} : vector<64x128xf32> to vector<8x128xf32>
    %cst_27 = arith.constant dense<0.000000e+00> : vector<8x128xf32>
    %144 = tpu.matmul %142, %14, %cst_27 {dimension_numbers = #tpu.dot_dimension_numbers<[1], [0], [0], [1], [0, 0, 1, 1], [], []>} : vector<8x32xf32>, vector<32x128xf32>, vector<8x128xf32> -> vector<8x128xf32>
    %145 = arith.addf %143, %144 : vector<8x128xf32>
    %146 = arith.negf %145 : vector<8x128xf32>
    %147 = math.exp %146 : vector<8x128xf32>
    %cst_28 = arith.constant 1.000000e+00 : f32
    %148 = vector.broadcast %cst_28 : f32 to vector<8x128xf32>
    %149 = arith.addf %148, %147 : vector<8x128xf32>
    %150 = arith.divf %148, %149 : vector<8x128xf32>
    %151 = math.tanh %145 : vector<8x128xf32>
    %152 = vector.extract_strided_slice %150 {offsets = [0, 0], sizes = [8, 32], strides = [1, 1]} : vector<8x128xf32> to vector<8x32xf32>
    %153 = vector.extract_strided_slice %150 {offsets = [0, 32], sizes = [8, 32], strides = [1, 1]} : vector<8x128xf32> to vector<8x32xf32>
    %154 = vector.extract_strided_slice %151 {offsets = [0, 64], sizes = [8, 32], strides = [1, 1]} : vector<8x128xf32> to vector<8x32xf32>
    %155 = vector.extract_strided_slice %150 {offsets = [0, 96], sizes = [8, 32], strides = [1, 1]} : vector<8x128xf32> to vector<8x32xf32>
    %156 = arith.mulf %153, %140 : vector<8x32xf32>
    %157 = arith.mulf %152, %154 : vector<8x32xf32>
    %158 = arith.addf %156, %157 : vector<8x32xf32>
    %159 = math.tanh %158 : vector<8x32xf32>
    %160 = arith.mulf %155, %159 : vector<8x32xf32>
    %161 = vector.extract_strided_slice %8 {offsets = [56, 0], sizes = [8, 16], strides = [1, 1]} : vector<64x16xf32> to vector<8x16xf32>
    %c0_29 = arith.constant 0 : index
    %c0_30 = arith.constant 0 : index
    %162 = vector.load %arg5[%c0_29, %c0_30] : memref<16x128xf32, #tpu.memory_space<vmem>>, vector<16x128xf32>
    %cst_31 = arith.constant dense<0.000000e+00> : vector<8x128xf32>
    %163 = tpu.matmul %161, %162, %cst_31 {dimension_numbers = #tpu.dot_dimension_numbers<[1], [0], [0], [1], [0, 0, 1, 1], [], []>} : vector<8x16xf32>, vector<16x128xf32>, vector<8x128xf32> -> vector<8x128xf32>
    %c0_32 = arith.constant 0 : index
    %c0_33 = arith.constant 0 : index
    %164 = vector.load %arg6[%c0_32, %c0_33] : memref<1x128xf32, #tpu.memory_space<vmem>>, vector<1x128xf32>
    %165 = vector.broadcast %164 : vector<1x128xf32> to vector<8x128xf32>
    %166 = arith.addf %163, %165 : vector<8x128xf32>
    %167 = arith.negf %166 : vector<8x128xf32>
    %168 = math.exp %167 : vector<8x128xf32>
    %cst_34 = arith.constant 1.000000e+00 : f32
    %169 = vector.broadcast %cst_34 : f32 to vector<8x128xf32>
    %170 = arith.addf %169, %168 : vector<8x128xf32>
    %171 = arith.divf %169, %170 : vector<8x128xf32>
    %172 = math.tanh %166 : vector<8x128xf32>
    %173 = vector.extract_strided_slice %171 {offsets = [0, 0], sizes = [8, 32], strides = [1, 1]} : vector<8x128xf32> to vector<8x32xf32>
    %174 = vector.extract_strided_slice %172 {offsets = [0, 64], sizes = [8, 32], strides = [1, 1]} : vector<8x128xf32> to vector<8x32xf32>
    %175 = vector.extract_strided_slice %171 {offsets = [0, 96], sizes = [8, 32], strides = [1, 1]} : vector<8x128xf32> to vector<8x32xf32>
    %176 = arith.mulf %173, %174 : vector<8x32xf32>
    %177 = math.tanh %176 : vector<8x32xf32>
    %178 = arith.mulf %175, %177 : vector<8x32xf32>
    %c0_35 = arith.constant 0 : index
    %c0_36 = arith.constant 0 : index
    %179 = vector.load %arg8[%c0_35, %c0_36] : memref<32x6xf32, #tpu.memory_space<vmem>>, vector<32x6xf32>
    %cst_37 = arith.constant dense<0.000000e+00> : vector<8x6xf32>
    %180 = tpu.matmul %160, %179, %cst_37 {dimension_numbers = #tpu.dot_dimension_numbers<[1], [0], [0], [1], [0, 0, 1, 1], [], []>} : vector<8x32xf32>, vector<32x6xf32>, vector<8x6xf32> -> vector<8x6xf32>
    %c0_38 = arith.constant 0 : index
    %c0_39 = arith.constant 0 : index
    %181 = vector.load %arg9[%c0_38, %c0_39] : memref<32x6xf32, #tpu.memory_space<vmem>>, vector<32x6xf32>
    %cst_40 = arith.constant dense<0.000000e+00> : vector<8x6xf32>
    %182 = tpu.matmul %178, %181, %cst_40 {dimension_numbers = #tpu.dot_dimension_numbers<[1], [0], [0], [1], [0, 0, 1, 1], [], []>} : vector<8x32xf32>, vector<32x6xf32>, vector<8x6xf32> -> vector<8x6xf32>
    %183 = arith.addf %180, %182 : vector<8x6xf32>
    %c0_41 = arith.constant 0 : index
    %c0_42 = arith.constant 0 : index
    %184 = vector.load %arg10[%c0_41, %c0_42] : memref<1x6xf32, #tpu.memory_space<vmem>>, vector<1x6xf32>
    %185 = vector.broadcast %184 : vector<1x6xf32> to vector<8x6xf32>
    %186 = arith.addf %183, %185 : vector<8x6xf32>
    %c0_43 = arith.constant 0 : index
    %c0_44 = arith.constant 0 : index
    %187 = vector.load %arg11[%c0_43, %c0_44] : memref<8x6xf32, #tpu.memory_space<vmem>>, vector<8x6xf32>
    tpu.vector_store %arg11[%c0_43, %c0_44], %186 {strides = array<i32>} : memref<8x6xf32, #tpu.memory_space<vmem>>, vector<8x6xf32>,
    return
  }
  func.func @transform_0(%arg0: i32) -> (i32, i32, i32) {
    %c0_i32 = arith.constant 0 : i32
    %c0_i32_0 = arith.constant 0 : i32
    %c0_i32_1 = arith.constant 0 : i32
    return %arg0, %c0_i32, %c0_i32_0 : i32, i32, i32
  }
  func.func @transform_1(%arg0: i32) -> (i32, i32) {
    %c0_i32 = arith.constant 0 : i32
    %c0_i32_0 = arith.constant 0 : i32
    %c0_i32_1 = arith.constant 0 : i32
    return %c0_i32, %c0_i32_0 : i32, i32
  }
  func.func @transform_2(%arg0: i32) -> (i32, i32) {
    %c0_i32 = arith.constant 0 : i32
    %c0_i32_0 = arith.constant 0 : i32
    %c0_i32_1 = arith.constant 0 : i32
    return %c0_i32, %c0_i32_0 : i32, i32
  }
  func.func @transform_3(%arg0: i32) -> (i32, i32) {
    %c0_i32 = arith.constant 0 : i32
    %c0_i32_0 = arith.constant 0 : i32
    %c0_i32_1 = arith.constant 0 : i32
    return %c0_i32, %c0_i32_0 : i32, i32
  }
  func.func @transform_4(%arg0: i32) -> (i32, i32) {
    %c0_i32 = arith.constant 0 : i32
    %c0_i32_0 = arith.constant 0 : i32
    %c0_i32_1 = arith.constant 0 : i32
    return %c0_i32, %c0_i32_0 : i32, i32
  }
  func.func @transform_5(%arg0: i32) -> (i32, i32) {
    %c0_i32 = arith.constant 0 : i32
    %c0_i32_0 = arith.constant 0 : i32
    %c0_i32_1 = arith.constant 0 : i32
    return %c0_i32, %c0_i32_0 : i32, i32
  }
  func.func @transform_6(%arg0: i32) -> (i32, i32) {
    %c0_i32 = arith.constant 0 : i32
    %c0_i32_0 = arith.constant 0 : i32
    %c0_i32_1 = arith.constant 0 : i32
    return %c0_i32, %c0_i32_0 : i32, i32
  }
  func.func @transform_7(%arg0: i32) -> (i32, i32) {
    %c0_i32 = arith.constant 0 : i32
    %c0_i32_0 = arith.constant 0 : i32
    %c0_i32_1 = arith.constant 0 : i32
    return %c0_i32, %c0_i32_0 : i32, i32
  }
  func.func @transform_8(%arg0: i32) -> (i32, i32) {
    %c0_i32 = arith.constant 0 : i32
    %c0_i32_0 = arith.constant 0 : i32
    %c0_i32_1 = arith.constant 0 : i32
    return %c0_i32, %c0_i32_0 : i32, i32
  }
  func.func @transform_9(%arg0: i32) -> (i32, i32) {
    %c0_i32 = arith.constant 0 : i32
    %c0_i32_0 = arith.constant 0 : i32
    %c0_i32_1 = arith.constant 0 : i32
    return %c0_i32, %c0_i32_0 : i32, i32
  }
  func.func @transform_10(%arg0: i32) -> (i32, i32) {
    %c0_i32 = arith.constant 0 : i32
    %c0_i32_0 = arith.constant 0 : i32
    return %arg0, %c0_i32 : i32, i32
  }
}

</mosaic_0001>

<bundles_post_ra>
// kernel: bilstm_classifier_forward.1
= control target key start
LH: loop header
LB: loop body
LE: loop exit
PB: predicated region body
PF: predicated region fallthrough
CT: control target
= control target key end

     0   :  { %v1889_v0 = vmov 0   ;;  %vm125_vm0 = vcmask 1041408   ;;  %v43_v22 = vlaneseq  ;;  %vm100_vm1 = vcmask 408576   ;;  %s1894_s13 = smov 32   ;;  %s1895_s22 = smov 96   ;;  %s2210_s0 = inlined_call_operand.vmem [shape: s32[1,64,1], index: 0, kind: input, shape index: {}]   ;;  %s2211_s1 = inlined_call_operand.vmem [shape: f32[50,16], index: 1, kind: input, shape index: {}]   ;;  %s2212_s2 = inlined_call_operand.vmem [shape: f32[16,128], index: 2, kind: input, shape index: {}]   ;;  %s2213_s6 = inlined_call_operand.vmem [shape: f32[32,128], index: 6, kind: input, shape index: {}]   ;;  %s2214_s3 = inlined_call_operand.vmem [shape: f32[1,128], index: 3, kind: input, shape index: {}]   ;;  %s2215_s4 = inlined_call_operand.vmem [shape: f32[16,128], index: 4, kind: input, shape index: {}]   ;;  %s2216_s5 = inlined_call_operand.vmem [shape: f32[1,128], index: 5, kind: input, shape index: {}]   ;;  %s2217_s8 = inlined_call_operand.vmem [shape: f32[32,6], index: 8, kind: input, shape index: {}]   ;;  %s2218_s7 = inlined_call_operand.vmem [shape: f32[32,6], index: 7, kind: input, shape index: {}]   ;;  %s2219_s9 = inlined_call_operand.vmem [shape: f32[1,6], index: 9, kind: input, shape index: {}]   ;;  %s2220_s10 = inlined_call_operand.vmem [shape: f32[8,6], index: 10, kind: output, shape index: {}]  }
   0x1   :  { %1816 = vset.pattern.permute.xlu1 %v1889_v0  ;;  %1815 = vset.pattern.permute.xlu0 %v1889_v0  ;;  %v37_v1 = vld [vmem:[%s2210_s0 + $0x10] sm:$0xff]  ;;  %v35_v2 = vld [vmem:[%s2210_s0] sm:$0xff]  ;;  %v38_v3 = vld [vmem:[%s2210_s0 + $0x18] sm:$0xff]  ;;  %v1890_v26 = vmov 0.0   ;;  %v1891_v41 = vmov 0.0|0.0   ;;  %vm1892_vm10 = vmmov 0  }
   0x2   :  { %52 = vperm.xlu1 %1816, %v37_v1   ;;  %46 = vperm.xlu0 %1815, %v35_v2   ;;  %v36_v4 = vld [vmem:[%s2210_s0 + $0x8] sm:$0xff]  ;;  %v93_v5 = vld [vmem:[%s2211_s1] sm:$0xff]  ;;  %v95_v7 = vld [vmem:[%s2211_s1 + $0x10] sm:$0xff]  ;;  %v44_v23 = vand.u32 127, %v43_v22  ;;  %vm243_vm11 = vcmask 130048   ;;  %vm377_vm12 = vcmask 261120  }
   0x3   :  { %v94_v6 = vld [vmem:[%s2211_s1 + $0x8] sm:$0xff]  ;;  %v96_v8 = vld [vmem:[%s2211_s1 + $0x18] sm:$0xff]  ;;  %v97_v11 = vld [vmem:[%s2211_s1 + $0x20] sm:$0xff]  ;;  %vm1439_vm13 = vcmask 48128  }
   0x4   :  { %v1729_v9 = vpack.c.bf16 %v94_v6, %v93_v5  ;;  %v1733_v10 = vpack.c.bf16 %v96_v8, %v95_v7  ;;  %v98_v12 = vld [vmem:[%s2211_s1 + $0x28] sm:$0xff]  ;;  %v39_v14 = vld [vmem:[%s2210_s0 + $0x20] sm:$0xff]  ;;  %v42_v16 = vld [vmem:[%s2210_s0 + $0x38] sm:$0xff] }
   0x5   :  { %v40_v13 = vld [vmem:[%s2210_s0 + $0x28] sm:$0xff]  ;;  %v1737_v15 = vpack.c.bf16 %v98_v12, %v97_v11  ;;  %v41_v17 = vld [vmem:[%s2210_s0 + $0x30] sm:$0xff]  ;;  %v234_v19 = vld [vmem:[%s2212_s2] sm:$0xff] }
   0x6   :  { %55 = vperm.xlu1 %1816, %v38_v3   ;;  %49 = vperm.xlu0 %1815, %v36_v4   ;;  %v99_v18 = vld [vmem:[%s2211_s1 + $0x30] sm:$0x3]  ;;  %v235_v20 = vld [vmem:[%s2212_s2 + $0x8] sm:$0xff]  ;;  %v373_v42 = vld [vmem:[%s2213_s6] sm:$0xff] }
   0x7   :  { %1730 = vmatprep.subr.bf16.mxu0 %v1729_v9  ;;  %v1741_v21 = vpack.c.bf16 %v235_v20, %v234_v19  ;;  %v374_v43 = vld [vmem:[%s2213_s6 + $0x8] sm:$0xff]  ;;  %v375_v45 = vld [vmem:[%s2213_s6 + $0x10] sm:$0xff]  ;;  %v376_v46 = vld [vmem:[%s2213_s6 + $0x18] sm:$0xff] }
   0x8   :  { %1732 = vmatpush3.bf16.msra.mxu0 %v1729_v9  ;;  %v2026_v44 = vpack.c.bf16 %v374_v43, %v373_v42  ;;  %v2036_v47 = vpack.c.bf16 %v376_v46, %v375_v45  ;;  %v1462_v56 = vld [vmem:[%s2214_s3] ss:$0 sm:$0xff]  ;;  %s1893_s3 = smov 64  }
   0x9   :  { %1734 = vmatprep.subr.bf16.mxu0 %v1733_v10  ;;  %1742 = vmatprep.subr.bf16.mxu1 %v1741_v21 }
   0xa   :  { %61 = vperm.xlu1 %1816, %v40_v13   ;;  %58 = vperm.xlu0 %1815, %v39_v14  }
   0xb   :  { %1744 = vmatpush3.bf16.msra.mxu1 %v1741_v21 }
   0xc   :  { %1736 = vmatpush3.bf16.msra.mxu0 %v1733_v10  ;;  %1745 = vmatprep.subr.bf16.mxu1 %v1891_v41 }
   0xd   :  { %1738 = vmatprep.subr.bf16.mxu0 %v1737_v15 }
   0xe   :  { %67 = vperm.xlu1 %1816, %v42_v16   ;;  %64 = vperm.xlu0 %1815, %v41_v17  }
  0x10   :  { %1740 = vmatpush3.bf16.msra.mxu0 %v1737_v15 }
  0x11   :  { %1582 = vmatprep.subr.msk.mxu0 %vm125_vm0, %v99_v18 }
  0x14   :  { %1583 = vmatpush3.msk.msra.mxu0 %vm125_vm0, %v99_v18 }
  0x15   :  { %1757 = vmatprep.subr.bf16.mxu0 %v1891_v41 }
  0x81   :  { %v53_v24 = vpop.permute.xlu1 %52  ;;  %v47_v25 = vpop.permute.xlu0 %46 }
  0x82   :  { %vm69_vm2 = vcmp.eq.s32.totalorder %v44_v23, %v47_v25  ;;  %vm71_vm3 = vcmp.eq.s32.totalorder %v44_v23, %v53_v24 }
  0x83   :  { %v1445_v27 = vsel %vm69_vm2, 1.0, %v1890_v26  ;;  %v1447_v30 = vsel %vm71_vm3, 1.0, %v1890_v26 }
  0x84   :  { %1584 = vmatprep.mubr.msk.f32.mxu0 %vm100_vm1, %v1445_v27 }
  0x85   :  { %v56_v28 = vpop.permute.xlu1 %55  ;;  %v50_v29 = vpop.permute.xlu0 %49 }
  0x86   :  { %vm70_vm4 = vcmp.eq.s32.totalorder %v44_v23, %v50_v29  ;;  %vm72_vm5 = vcmp.eq.s32.totalorder %v44_v23, %v56_v28 }
  0x87   :  { %v1446_v31 = vsel %vm70_vm4, 1.0, %v1890_v26  ;;  %v1448_v34 = vsel %vm72_vm5, 1.0, %v1890_v26 }
  0x88   :  { %1585 = vmatmul.mubr.msk.f32.vlgmr.msra.gmra.mrb[0].mxu0 %vm100_vm1, %v1446_v31 }
  0x89   :  { %v62_v32 = vpop.permute.xlu1 %61  ;;  %1587 = vmatprep.mubr.msk.f32.mxu0 %vm100_vm1, %v1447_v30  ;;  %v59_v33 = vpop.permute.xlu0 %58  ;;  %1759 = vmatpush3.bf16.msra.mxu0 %v2026_v44 }
  0x8a   :  { %vm73_vm6 = vcmp.eq.s32.totalorder %v44_v23, %v59_v33  ;;  %vm74_vm7 = vcmp.eq.s32.totalorder %v44_v23, %v62_v32  ;;  %1760 = vmatprep.subr.bf16.mxu0 %v1891_v41 }
  0x8b   :  { %v1449_v35 = vsel %vm73_vm6, 1.0, %v1890_v26  ;;  %v1450_v38 = vsel %vm74_vm7, 1.0, %v1890_v26 }
  0x8c   :  { %1588 = vmatmul.mubr.msk.f32.gmra.mrb[2].mxu0 %vm100_vm1, %v1448_v34 }
  0x8d   :  { %v68_v36 = vpop.permute.xlu1 %67  ;;  %1590 = vmatprep.mubr.msk.f32.mxu0 %vm100_vm1, %v1449_v35  ;;  %v65_v37 = vpop.permute.xlu0 %64  ;;  %1762 = vmatpush3.bf16.msra.mxu0 %v2036_v47 }
  0x8e   :  { %vm75_vm8 = vcmp.eq.s32.totalorder %v44_v23, %v65_v37  ;;  %vm76_vm9 = vcmp.eq.s32.totalorder %v44_v23, %v68_v36  ;;  %1769 = vmatprep.subr.bf16.mxu0 %v1891_v41 }
  0x8f   :  { %v1451_v39 = vsel %vm75_vm8, 1.0, %v1890_v26  ;;  %v1452_v40 = vsel %vm76_vm9, 1.0, %v1890_v26 }
  0x90   :  { %1591 = vmatmul.mubr.msk.f32.gmra.mrb[4].mxu0 %vm100_vm1, %v1450_v38 }
  0x91   :  { %1593 = vmatprep.mubr.msk.f32.mxu0 %vm100_vm1, %v1451_v39 }
  0x94   :  { %1594 = vmatmul.mubr.msk.f32.gmra.mrb[6].mxu0 %vm100_vm1, %v1452_v40 }
  0x95   :  { %1642 = vmatprep.mubr.msk.f32.mxu0 %vm1892_vm10, %v1890_v26 }
 0x15b   :  { %v1586_v48 = vpop.f32.mrb[0].mxu0 }
 0x15c   :  { %v195_v49 = vpop.f32.mrb[1].mxu0 }
 0x15d   :  { %1600 = vmatprep.mubr.msk.f32.mxu1 %vm243_vm11, %v195_v49 }
 0x15e   :  { %1601 = vmatmul.mubr.msk.f32.vlgmr.msra.gmra.mrb[0].mxu1 %vm243_vm11, %v1586_v48 }
 0x15f   :  { %1747 = vmatpush3.bf16.msra.mxu1 %v2026_v44  ;;  %v1589_v50 = vpop.f32.mrb[2].mxu0 }
 0x160   :  { %v205_v51 = vpop.f32.mrb[3].mxu0  ;;  %1748 = vmatprep.subr.bf16.mxu1 %v1891_v41 }
 0x161   :  { %1603 = vmatprep.mubr.msk.f32.mxu1 %vm243_vm11, %v205_v51 }
 0x162   :  { %1604 = vmatmul.mubr.msk.f32.gmra.mrb[2].mxu1 %vm243_vm11, %v1589_v50 }
 0x163   :  { %v1592_v52 = vpop.f32.mrb[4].mxu0  ;;  %1750 = vmatpush3.bf16.msra.mxu1 %v2036_v47 }
 0x164   :  { %v215_v53 = vpop.f32.mrb[5].mxu0  ;;  %1751 = vmatprep.subr.bf16.mxu1 %v1891_v41 }
 0x165   :  { %1606 = vmatprep.mubr.msk.f32.mxu1 %vm243_vm11, %v215_v53 }
 0x166   :  { %1607 = vmatmul.mubr.msk.f32.gmra.mrb[4].mxu1 %vm243_vm11, %v1592_v52 }
 0x167   :  { %v2052_v54 = vpop.f32.mrb[6].mxu0 }
 0x168   :  { %v225_v55 = vpop.f32.mrb[7].mxu0 }
 0x169   :  { %1609 = vmatprep.mubr.msk.f32.mxu1 %vm243_vm11, %v225_v55 }
 0x16a   :  { %1610 = vmatmul.mubr.msk.f32.gmra.mrb[6].mxu1 %vm243_vm11, %v2052_v54 }
 0x16b   :  { %1620 = vmatprep.mubr.msk.f32.mxu1 %vm1892_vm10, %v1890_v26 }
 0x16e   :  { %1621 = vmatmul.mubr.f32.vlgmr.msra.gmra.mrb[8].mxu1 %v1890_v26 }
 0x16f   :  { %1753 = vmatpush3.bf16.msra.mxu1 %v2026_v44  ;;  %1631 = vmatprep.mubr.msk.f32.mxu1 %vm1892_vm10, %v1890_v26 }
 0x170   :  { %1754 = vmatprep.subr.bf16.mxu1 %v1891_v41 }
 0x173   :  { %1756 = vmatpush3.bf16.msra.mxu1 %v2036_v47 }
 0x174   :  { %1763 = vmatprep.subr.bf16.mxu1 %v1891_v41 }
 0x231   :  { %v1602_v57 = vpop.f32.mrb[0].mxu1 }
 0x232   :  { %v340_v58 = vadd.f32 %v1602_v57, %v1462_v56  ;;  %v334_v59 = vpop.f32.mrb[1].mxu1 }
 0x233   :  { %v335_v8 = vadd.f32 %v1462_v56, %v334_v59 }
 0x235   :  { %v1605_v60 = vpop.f32.mrb[2].mxu1 }
 0x236   :  { %v2069_v61 = vadd.f32 %v1605_v60, %v1462_v56  ;;  %v344_v62 = vpop.f32.mrb[3].mxu1 }
 0x237   :  { %v2071_v63 = vadd.f32 %v1462_v56, %v344_v62 }
 0x239   :  { %v1608_v0 = vpop.f32.mrb[4].mxu1 }
 0x23a   :  { %v2073_v1 = vadd.f32 %v1608_v0, %v1462_v56  ;;  %v354_v2 = vpop.f32.mrb[5].mxu1 }
 0x23b   :  { %v2075_v3 = vadd.f32 %v1462_v56, %v354_v2 }
 0x23d   :  { %v1611_v4 = vpop.f32.mrb[6].mxu1 }
 0x23e   :  { %v2077_v5 = vadd.f32 %v1611_v4, %v1462_v56  ;;  %v364_v6 = vpop.f32.mrb[7].mxu1 }
 0x23f   :  { %v2079_v7 = vadd.f32 %v1462_v56, %v364_v6 }
 0x241   :  { %v447_v9 = vpop.f32.mrb[8].mxu1 }
 0x242   :  { %v451_v10 = vadd.f32 %v447_v9, %v335_v8  ;;  %v1622_v11 = vpop.f32.mrb[9].mxu1 }
 0x244   :  { %1817 = vtanh.f32 %v451_v10  ;;  %v1471_v13 = vmul.f32 -1.442695, %v451_v10 }
 0x246   :  { %1819 = vpow2.f32 %v1471_v13 }
 0x24e   :  { %v1818_v12 = vpop.eup %1817 }
 0x24f   :  { %461 = vrot.lane.b32.xlu0 %v1818_v12, %s1893_s3 }
 0x250   :  { %v1820_v14 = vpop.eup %1819 }
 0x251   :  { %v455_v15 = vadd.f32 1.0, %v1820_v14 }
 0x253   :  { %1821 = vrcp.f32 %v455_v15 }
 0x25d   :  { %v1822_v16 = vpop.eup %1821 }
 0x25e   :  { %v459_v19 = vmul.f32 0.0, %v1822_v16 }
 0x2c1   :  { %v462_v17 = vpop.permute.xlu0 %461 }
 0x2c2   :  { %v464_v18 = vmul.f32 %v1822_v16, %v462_v17 }
 0x2c4   :  { %466 = vrot.lane.b32.xlu1 %v464_v18, %s1894_s13 }
 0x336   :  { %v467_v20 = vpop.permute.xlu1 %466 }
 0x337   :  { %v469_v21 = vadd.f32 %v467_v20, %v459_v19 }
 0x339   :  { %1823 = vtanh.f32 %v469_v21 }
 0x343   :  { %v1824_v22 = vpop.eup %1823 }
 0x344   :  { %472 = vrot.lane.b32.xlu0 %v1824_v22, %s1893_s3 }
 0x3b6   :  { %v473_v23 = vpop.permute.xlu0 %472 }
 0x3b7   :  { %v475_v24 = vmul.f32 %v1822_v16, %v473_v23 }
 0x3b9   :  { %477 = vrot.lane.b32.xlu1 %v475_v24, %s1894_s13 }
 0x42b   :  { %v478_v25 = vpop.permute.xlu1 %477 }
 0x42c   :  { %1632 = vmatmul.mubr.msk.f32.vlgmr.msra.gmra.mrb[10].mxu1 %vm377_vm12, %v478_v25 }
 0x42d   :  { %1765 = vmatpush3.bf16.msra.mxu1 %v2026_v44  ;;  %1653 = vmatprep.mubr.msk.f32.mxu1 %vm1892_vm10, %v1890_v26 }
 0x42e   :  { %1766 = vmatprep.subr.bf16.mxu1 %v1891_v41 }
 0x431   :  { %1768 = vmatpush3.bf16.msra.mxu1 %v2036_v47 }
 0x432   :  { %1775 = vmatprep.subr.bf16.mxu1 %v1891_v41 }
 0x4ff   :  { %v547_v27 = vpop.f32.mrb[10].mxu1 }
 0x500   :  { %v551_v28 = vadd.f32 %v547_v27, %v340_v58  ;;  %v1633_v29 = vpop.f32.mrb[11].mxu1 }
 0x502   :  { %1825 = vtanh.f32 %v551_v28  ;;  %v1473_v31 = vmul.f32 -1.442695, %v551_v28 }
 0x504   :  { %1827 = vpow2.f32 %v1473_v31 }
 0x50c   :  { %v1826_v30 = vpop.eup %1825 }
 0x50d   :  { %561 = vrot.lane.b32.xlu0 %v1826_v30, %s1893_s3 }
 0x50e   :  { %v1828_v32 = vpop.eup %1827 }
 0x50f   :  { %v555_v33 = vadd.f32 1.0, %v1828_v32 }
 0x511   :  { %1829 = vrcp.f32 %v555_v33 }
 0x51b   :  { %v1830_v34 = vpop.eup %1829 }
 0x51c   :  { %v559_v37 = vmul.f32 %v1830_v34, %v469_v21 }
 0x57f   :  { %v562_v35 = vpop.permute.xlu0 %561 }
 0x580   :  { %v564_v36 = vmul.f32 %v1830_v34, %v562_v35 }
 0x582   :  { %566 = vrot.lane.b32.xlu1 %v564_v36, %s1894_s13 }
 0x5f4   :  { %v567_v38 = vpop.permute.xlu1 %566 }
 0x5f5   :  { %v569_v39 = vadd.f32 %v567_v38, %v559_v37 }
 0x5f7   :  { %1831 = vtanh.f32 %v569_v39 }
 0x601   :  { %v1832_v40 = vpop.eup %1831 }
 0x602   :  { %572 = vrot.lane.b32.xlu0 %v1832_v40, %s1893_s3 }
 0x674   :  { %v573_v42 = vpop.permute.xlu0 %572 }
 0x675   :  { %v575_v43 = vmul.f32 %v1830_v34, %v573_v42 }
 0x677   :  { %577 = vrot.lane.b32.xlu1 %v575_v43, %s1894_s13 }
 0x6e9   :  { %v578_v45 = vpop.permute.xlu1 %577 }
 0x6ea   :  { %1643 = vmatmul.mubr.msk.f32.vlgmr.msra.gmra.mrb[8].mxu0 %vm377_vm12, %v578_v45 }
 0x6eb   :  { %1771 = vmatpush3.bf16.msra.mxu0 %v2026_v44  ;;  %1664 = vmatprep.mubr.msk.f32.mxu0 %vm1892_vm10, %v1890_v26 }
 0x6ec   :  { %1772 = vmatprep.subr.bf16.mxu0 %v1891_v41 }
 0x6ef   :  { %1774 = vmatpush3.bf16.msra.mxu0 %v2036_v47 }
 0x6f0   :  { %1781 = vmatprep.subr.bf16.mxu0 %v1891_v41 }
 0x7bd   :  { %v647_v46 = vpop.f32.mrb[8].mxu0 }
 0x7be   :  { %v651_v48 = vadd.f32 %v647_v46, %v2071_v63  ;;  %v1644_v49 = vpop.f32.mrb[9].mxu0 }
 0x7c0   :  { %1833 = vtanh.f32 %v651_v48  ;;  %v1475_v51 = vmul.f32 -1.442695, %v651_v48 }
 0x7c2   :  { %1835 = vpow2.f32 %v1475_v51 }
 0x7ca   :  { %v1834_v50 = vpop.eup %1833 }
 0x7cb   :  { %661 = vrot.lane.b32.xlu0 %v1834_v50, %s1893_s3 }
 0x7cc   :  { %v1836_v52 = vpop.eup %1835 }
 0x7cd   :  { %v655_v53 = vadd.f32 1.0, %v1836_v52 }
 0x7cf   :  { %1837 = vrcp.f32 %v655_v53 }
 0x7d9   :  { %v1838_v55 = vpop.eup %1837 }
 0x7da   :  { %v659_v58 = vmul.f32 %v1838_v55, %v569_v39 }
 0x83d   :  { %v662_v56 = vpop.permute.xlu0 %661 }
 0x83e   :  { %v664_v57 = vmul.f32 %v1838_v55, %v662_v56  ;;  %v1176_v56 = vld [vmem:[%s2215_s4] sm:$0xff] }
 0x840   :  { %666 = vrot.lane.b32.xlu1 %v664_v57, %s1894_s13  ;;  %v1177_v57 = vld [vmem:[%s2215_s4 + $0x8] sm:$0xff] }
 0x8b2   :  { %v667_v59 = vpop.permute.xlu1 %666 }
 0x8b3   :  { %v669_v60 = vadd.f32 %v667_v59, %v659_v58  ;;  %v1794_v58 = vpack.c.bf16 %v1177_v57, %v1176_v56 }
 0x8b5   :  { %1839 = vtanh.f32 %v669_v60 }
 0x8bf   :  { %v1840_v62 = vpop.eup %1839 }
 0x8c0   :  { %672 = vrot.lane.b32.xlu0 %v1840_v62, %s1893_s3 }
 0x932   :  { %v673_v63 = vpop.permute.xlu0 %672 }
 0x933   :  { %v675_v0 = vmul.f32 %v1838_v55, %v673_v63 }
 0x935   :  { %677 = vrot.lane.b32.xlu1 %v675_v0, %s1894_s13 }
 0x9a7   :  { %v678_v2 = vpop.permute.xlu1 %677 }
 0x9a8   :  { %1654 = vmatmul.mubr.msk.f32.vlgmr.msra.gmra.mrb[12].mxu1 %vm377_vm12, %v678_v2 }
 0x9a9   :  { %1777 = vmatpush3.bf16.msra.mxu1 %v2026_v44  ;;  %1675 = vmatprep.mubr.msk.f32.mxu1 %vm1892_vm10, %v1890_v26 }
 0x9aa   :  { %1778 = vmatprep.subr.bf16.mxu1 %v1891_v41 }
 0x9ad   :  { %1780 = vmatpush3.bf16.msra.mxu1 %v2036_v47 }
 0x9ae   :  { %1787 = vmatprep.subr.bf16.mxu1 %v1891_v41 }
 0xa7b   :  { %v747_v4 = vpop.f32.mrb[12].mxu1 }
 0xa7c   :  { %v751_v6 = vadd.f32 %v747_v4, %v2069_v61  ;;  %v1655_v8 = vpop.f32.mrb[13].mxu1 }
 0xa7e   :  { %1841 = vtanh.f32 %v751_v6  ;;  %v1477_v10 = vmul.f32 -1.442695, %v751_v6 }
 0xa80   :  { %1843 = vpow2.f32 %v1477_v10 }
 0xa88   :  { %v1842_v9 = vpop.eup %1841 }
 0xa89   :  { %761 = vrot.lane.b32.xlu0 %v1842_v9, %s1893_s3 }
 0xa8a   :  { %v1844_v11 = vpop.eup %1843 }
 0xa8b   :  { %v755_v12 = vadd.f32 1.0, %v1844_v11 }
 0xa8d   :  { %1845 = vrcp.f32 %v755_v12 }
 0xa97   :  { %v1846_v13 = vpop.eup %1845 }
 0xa98   :  { %v759_v16 = vmul.f32 %v1846_v13, %v669_v60 }
 0xafb   :  { %v762_v14 = vpop.permute.xlu0 %761 }
 0xafc   :  { %v764_v15 = vmul.f32 %v1846_v13, %v762_v14 }
 0xafe   :  { %766 = vrot.lane.b32.xlu1 %v764_v15, %s1894_s13 }
 0xb70   :  { %v767_v17 = vpop.permute.xlu1 %766 }
 0xb71   :  { %v769_v18 = vadd.f32 %v767_v17, %v759_v16 }
 0xb73   :  { %1847 = vtanh.f32 %v769_v18 }
 0xb7d   :  { %v1848_v61 = vpop.eup %1847 }
 0xb7e   :  { %772 = vrot.lane.b32.xlu0 %v1848_v61, %s1893_s3 }
 0xbf0   :  { %v773_v19 = vpop.permute.xlu0 %772 }
 0xbf1   :  { %v775_v20 = vmul.f32 %v1846_v13, %v773_v19 }
 0xbf3   :  { %777 = vrot.lane.b32.xlu1 %v775_v20, %s1894_s13 }
 0xc65   :  { %v778_v21 = vpop.permute.xlu1 %777 }
 0xc66   :  { %1665 = vmatmul.mubr.msk.f32.vlgmr.msra.gmra.mrb[10].mxu0 %vm377_vm12, %v778_v21 }
 0xc67   :  { %1783 = vmatpush3.bf16.msra.mxu0 %v2026_v44  ;;  %1686 = vmatprep.mubr.msk.f32.mxu0 %vm1892_vm10, %v1890_v26 }
 0xc68   :  { %1784 = vmatprep.subr.bf16.mxu0 %v1891_v41 }
 0xc6b   :  { %1786 = vmatpush3.bf16.msra.mxu0 %v2036_v47 }
 0xc6c   :  { %1793 = vmatprep.subr.bf16.mxu0 %v1891_v41 }
 0xd39   :  { %v847_v22 = vpop.f32.mrb[10].mxu0 }
 0xd3a   :  { %v851_v23 = vadd.f32 %v847_v22, %v2075_v3  ;;  %v1666_v24 = vpop.f32.mrb[11].mxu0 }
 0xd3c   :  { %1849 = vtanh.f32 %v851_v23  ;;  %v1479_v27 = vmul.f32 -1.442695, %v851_v23 }
 0xd3e   :  { %1851 = vpow2.f32 %v1479_v27 }
 0xd46   :  { %v1850_v25 = vpop.eup %1849 }
 0xd47   :  { %861 = vrot.lane.b32.xlu0 %v1850_v25, %s1893_s3 }
 0xd48   :  { %v1852_v28 = vpop.eup %1851 }
 0xd49   :  { %v855_v29 = vadd.f32 1.0, %v1852_v28 }
 0xd4b   :  { %1853 = vrcp.f32 %v855_v29 }
 0xd55   :  { %v1854_v30 = vpop.eup %1853 }
 0xd56   :  { %v859_v33 = vmul.f32 %v1854_v30, %v769_v18  ;;  %v1486_v18 = vld [vmem:[%s2216_s5] ss:$0 sm:$0xff] }
 0xdb9   :  { %v862_v31 = vpop.permute.xlu0 %861 }
 0xdba   :  { %v864_v32 = vmul.f32 %v1854_v30, %v862_v31 }
 0xdbc   :  { %866 = vrot.lane.b32.xlu1 %v864_v32, %s1894_s13 }
 0xe2e   :  { %v867_v34 = vpop.permute.xlu1 %866 }
 0xe2f   :  { %v869_v35 = vadd.f32 %v867_v34, %v859_v33 }
 0xe31   :  { %1855 = vtanh.f32 %v869_v35 }
 0xe3b   :  { %v1856_v3 = vpop.eup %1855 }
 0xe3c   :  { %872 = vrot.lane.b32.xlu0 %v1856_v3, %s1893_s3  ;;  %v1278_v3 = vld [vmem:[%s2217_s8 + $0x8] sm:$0xff] }
 0xeae   :  { %v873_v36 = vpop.permute.xlu0 %872 }
 0xeaf   :  { %v875_v37 = vmul.f32 %v1854_v30, %v873_v36 }
 0xeb1   :  { %877 = vrot.lane.b32.xlu1 %v875_v37, %s1894_s13 }
 0xf23   :  { %v878_v38 = vpop.permute.xlu1 %877 }
 0xf24   :  { %1676 = vmatmul.mubr.msk.f32.vlgmr.msra.gmra.mrb[14].mxu1 %vm377_vm12, %v878_v38 }
 0xf25   :  { %1789 = vmatpush3.bf16.msra.mxu1 %v2026_v44  ;;  %1697 = vmatprep.mubr.msk.f32.mxu1 %vm1892_vm10, %v1890_v26 }
 0xf26   :  { %1790 = vmatprep.subr.bf16.mxu1 %v1891_v41 }
 0xf29   :  { %1792 = vmatpush3.bf16.msra.mxu1 %v2036_v47 }
 0xf2a   :  { %1802 = vmatprep.subr.bf16.mxu1 %v1891_v41 }
 0xff7   :  { %v947_v39 = vpop.f32.mrb[14].mxu1 }
 0xff8   :  { %v951_v40 = vadd.f32 %v947_v39, %v2073_v1  ;;  %v1677_v42 = vpop.f32.mrb[15].mxu1  ;;  %v1279_v39 = vld [vmem:[%s2217_s8 + $0x10] sm:$0xff] }
 0xffa   :  { %1857 = vtanh.f32 %v951_v40  ;;  %v1481_v45 = vmul.f32 -1.442695, %v951_v40  ;;  %v1280_v40 = vld [vmem:[%s2217_s8 + $0x18] sm:$0xff] }
 0xffc   :  { %1859 = vpow2.f32 %v1481_v45 }
0x1004   :  { %v1858_v43 = vpop.eup %1857 }
0x1005   :  { %961 = vrot.lane.b32.xlu0 %v1858_v43, %s1893_s3  ;;  %v1800_v43 = vpack.c.bf16 %v1280_v40, %v1279_v39 }
0x1006   :  { %v1860_v44 = vpop.eup %1859 }
0x1007   :  { %v955_v46 = vadd.f32 1.0, %v1860_v44  ;;  %v1273_v44 = vld [vmem:[%s2218_s7] sm:$0xff] }
0x1009   :  { %1861 = vrcp.f32 %v955_v46  ;;  %v1274_v46 = vld [vmem:[%s2218_s7 + $0x8] sm:$0xff] }
0x1013   :  { %v1862_v48 = vpop.eup %1861 }
0x1014   :  { %v959_v47 = vmul.f32 %v1862_v48, %v869_v35  ;;  %v1277_v35 = vld [vmem:[%s2217_s8] sm:$0xff] }
0x1015   :  { %v1797_v36 = vpack.c.bf16 %v1278_v3, %v1277_v35 }
0x1077   :  { %v962_v49 = vpop.permute.xlu0 %961 }
0x1078   :  { %v964_v50 = vmul.f32 %v1862_v48, %v962_v49  ;;  %v1803_v49 = vpack.c.bf16 %v1274_v46, %v1273_v44 }
0x107a   :  { %966 = vrot.lane.b32.xlu1 %v964_v50, %s1894_s13  ;;  %v1276_v50 = vld [vmem:[%s2218_s7 + $0x18] sm:$0xff] }
0x10ec   :  { %v967_v51 = vpop.permute.xlu1 %966 }
0x10ed   :  { %v969_v52 = vadd.f32 %v967_v51, %v959_v47 }
0x10ef   :  { %1863 = vtanh.f32 %v969_v52 }
0x10f9   :  { %v1864_v1 = vpop.eup %1863 }
0x10fa   :  { %972 = vrot.lane.b32.xlu0 %v1864_v1, %s1893_s3 }
0x116c   :  { %v973_v53 = vpop.permute.xlu0 %972 }
0x116d   :  { %v975_v55 = vmul.f32 %v1862_v48, %v973_v53  ;;  %v1275_v48 = vld [vmem:[%s2218_s7 + $0x10] sm:$0xff] }
0x116e   :  { %v1806_v47 = vpack.c.bf16 %v1276_v50, %v1275_v48 }
0x116f   :  { %977 = vrot.lane.b32.xlu1 %v975_v55, %s1894_s13 }
0x11e1   :  { %v978_v59 = vpop.permute.xlu1 %977 }
0x11e2   :  { %1687 = vmatmul.mubr.msk.f32.vlgmr.msra.gmra.mrb[12].mxu0 %vm377_vm12, %v978_v59 }
0x11e3   :  { %1795 = vmatpush3.bf16.msra.mxu0 %v1794_v58  ;;  %1704 = vmatprep.mubr.msk.f32.mxu0 %vm1892_vm10, %v1890_v26 }
0x11e4   :  { %1796 = vmatprep.subr.bf16.mxu0 %v1891_v41 }
0x11e6   :  { %1705 = vmatmul.mubr.msk.f32.vlgmr.msra.gmra.mrb[14].mxu0 %vm243_vm11, %v2052_v54 }
0x11e7   :  { %1715 = vmatprep.mubr.msk.f32.mxu0 %vm1892_vm10, %v1890_v26  ;;  %1798 = vmatpush3.bf16.msra.mxu0 %v1797_v36 }
0x11e8   :  { %1799 = vmatprep.subr.bf16.mxu0 %v1891_v41 }
0x11eb   :  { %1801 = vmatpush3.bf16.msra.mxu0 %v1800_v43 }
0x12b5   :  { %v1047_v60 = vpop.f32.mrb[12].mxu0 }
0x12b6   :  { %v1051_v62 = vadd.f32 %v1047_v60, %v2079_v7  ;;  %v1688_v63 = vpop.f32.mrb[13].mxu0  ;;  %v1491_v60 = vld [vmem:[%s2219_s9] ss:$0 sm:$0xff] }
0x12b8   :  { %1865 = vtanh.f32 %v1051_v62  ;;  %v1483_v6 = vmul.f32 -1.442695, %v1051_v62 }
0x12b9   :  { %v1251_v0 = vpop.f32.mrb[14].mxu0 }
0x12ba   :  { %v1706_v2 = vpop.f32.mrb[15].mxu0  ;;  %1867 = vpow2.f32 %v1483_v6  ;;  %v1252_v21 = vadd.f32 %v1486_v18, %v1251_v0 }
0x12bc   :  { %v1488_v25 = vmul.f32 -1.442695, %v1252_v21 }
0x12c2   :  { %v1866_v4 = vpop.eup %1865 }
0x12c3   :  { %1061 = vrot.lane.b32.xlu0 %v1866_v4, %s1893_s3 }
0x12c4   :  { %v1868_v8 = vpop.eup %1867 }
0x12c5   :  { %v1055_v9 = vadd.f32 1.0, %v1868_v8 }
0x12c7   :  { %1869 = vrcp.f32 %v1055_v9 }
0x12d1   :  { %v1870_v10 = vpop.eup %1869 }
0x12d2   :  { %v1059_v12 = vmul.f32 %v1870_v10, %v969_v52 }
0x1335   :  { %v1062_v54 = vpop.permute.xlu0 %1061 }
0x1336   :  { %v1064_v11 = vmul.f32 %v1870_v10, %v1062_v54 }
0x1338   :  { %1066 = vrot.lane.b32.xlu1 %v1064_v11, %s1894_s13 }
0x13aa   :  { %v1067_v13 = vpop.permute.xlu1 %1066 }
0x13ab   :  { %v1069_v7 = vadd.f32 %v1067_v13, %v1059_v12 }
0x13ad   :  { %1871 = vtanh.f32 %v1069_v7 }
0x13b7   :  { %v1872_v14 = vpop.eup %1871 }
0x13b8   :  { %1072 = vrot.lane.b32.xlu0 %v1872_v14, %s1893_s3 }
0x142a   :  { %v1073_v15 = vpop.permute.xlu0 %1072 }
0x142b   :  { %v1075_v16 = vmul.f32 %v1870_v10, %v1073_v15 }
0x142d   :  { %1077 = vrot.lane.b32.xlu1 %v1075_v16, %s1894_s13 }
0x149f   :  { %v1078_v17 = vpop.permute.xlu1 %1077 }
0x14a0   :  { %1698 = vmatmul.mubr.msk.f32.vlgmr.msra.gmra.mrb[16].mxu1 %vm377_vm12, %v1078_v17 }
0x14a1   :  { %1726 = vmatprep.mubr.msk.f32.mxu1 %vm1892_vm10, %v1890_v26  ;;  %1804 = vmatpush3.bf16.msra.mxu1 %v1803_v49 }
0x14a2   :  { %1805 = vmatprep.subr.bf16.mxu1 %v1891_v41 }
0x14a5   :  { %1807 = vmatpush3.bf16.msra.mxu1 %v1806_v47 }
0x1573   :  { %v1147_v61 = vpop.f32.mrb[16].mxu1 }
0x1574   :  { %v1151_v19 = vadd.f32 %v1147_v61, %v2077_v5  ;;  %v1699_v20 = vpop.f32.mrb[17].mxu1 }
0x1576   :  { %1873 = vtanh.f32 %v1151_v19  ;;  %v1485_v24 = vmul.f32 -1.442695, %v1151_v19 }
0x1577   :  { %1875 = vtanh.f32 %v1252_v21 }
0x1578   :  { %1877 = vpow2.f32 %v1485_v24 }
0x1579   :  { %1879 = vpow2.f32 %v1488_v25 }
0x1580   :  { %v1874_v22 = vpop.eup %1873 }
0x1581   :  { %1161 = vrot.lane.b32.xlu0 %v1874_v22, %s1893_s3  ;;  %v1876_v23 = vpop.eup %1875 }
0x1582   :  { %v1878_v26 = vpop.eup %1877 }
0x1583   :  { %v1155_v27 = vadd.f32 1.0, %v1878_v26  ;;  %v1880_v28 = vpop.eup %1879 }
0x1584   :  { %v1258_v29 = vadd.f32 1.0, %v1880_v28 }
0x1585   :  { %1263 = vrot.lane.b32.xlu0 %v1876_v23, %s1893_s3  ;;  %1881 = vrcp.f32 %v1155_v27 }
0x1586   :  { %1883 = vrcp.f32 %v1258_v29 }
0x158f   :  { %v1882_v5 = vpop.eup %1881 }
0x1590   :  { %v1884_v32 = vpop.eup %1883  ;;  %v1159_v38 = vmul.f32 %v1882_v5, %v1069_v7 }
0x15f3   :  { %v1162_v30 = vpop.permute.xlu0 %1161 }
0x15f4   :  { %v1164_v31 = vmul.f32 %v1882_v5, %v1162_v30 }
0x15f6   :  { %1166 = vrot.lane.b32.xlu1 %v1164_v31, %s1894_s13 }
0x15f7   :  { %v1264_v33 = vpop.permute.xlu0 %1263 }
0x15f8   :  { %v1266_v34 = vmul.f32 %v1884_v32, %v1264_v33 }
0x15fa   :  { %1885 = vtanh.f32 %v1266_v34 }
0x1604   :  { %v1886_v37 = vpop.eup %1885 }
0x1605   :  { %1269 = vrot.lane.b32.xlu0 %v1886_v37, %s1895_s22 }
0x1668   :  { %v1167_v42 = vpop.permute.xlu1 %1166 }
0x1669   :  { %v1169_v45 = vadd.f32 %v1167_v42, %v1159_v38 }
0x166b   :  { %1887 = vtanh.f32 %v1169_v45 }
0x1675   :  { %v1888_v51 = vpop.eup %1887 }
0x1676   :  { %1172 = vrot.lane.b32.xlu1 %v1888_v51, %s1893_s3 }
0x1677   :  { %v1270_v52 = vpop.permute.xlu0 %1269 }
0x1678   :  { %v1272_v1 = vmul.f32 %v1884_v32, %v1270_v52 }
0x167a   :  { %1282 = vrot.lane.b32.xlu1 %v1272_v1, %s1894_s13 }
0x16e8   :  { %v1173_v53 = vpop.permute.xlu1 %1172 }
0x16e9   :  { %v1175_v55 = vmul.f32 %v1882_v5, %v1173_v53 }
0x16eb   :  { %1357 = vrot.lane.b32.xlu0 %v1175_v55, %s1894_s13 }
0x16ec   :  { %v1283_v56 = vpop.permute.xlu1 %1282 }
0x16ed   :  { %1716 = vmatmul.mubr.msk.f32.vlgmr.msra.gmra.mrb[16].mxu0 %vm377_vm12, %v1283_v56 }
0x175d   :  { %v1358_v57 = vpop.permute.xlu0 %1357 }
0x175e   :  { %1727 = vmatmul.mubr.msk.f32.vlgmr.msra.gmra.mrb[18].mxu1 %vm377_vm12, %v1358_v57 }
0x17c0   :  { %v1352_v58 = vpop.f32.mrb[16].mxu0 }
0x17c1   :  { %v1717_v41 = vpop.f32.mrb[17].mxu0 }
0x1831   :  { %v1427_v59 = vpop.f32.mrb[18].mxu1 }
0x1832   :  { %v1428_v62 = vadd.f32 %v1427_v59, %v1352_v58  ;;  %v1728_v63 = vpop.f32.mrb[19].mxu1 }
0x1834   :  { %v1438_v0 = vadd.f32 %v1491_v60, %v1428_v62 }
0x1836   :  { %1440 = vst.msk [vmem:[%s2220_s10] sm:$0xff] %vm1439_vm13, %v1438_v0 }

</bundles_post_ra>
